<compile_context>
chip_gen: v5e
topology: v5e:2x2
jax: 0.10.0
libtpu: 0.0.40
codegen_flags: <defaults>
</compile_context>

<pallas_src>
import functools

import jax
import jax.numpy as jnp
from jax.experimental import pallas as pl
from jax.experimental.pallas import tpu as pltpu


# ---------------------------------------------------------------------------
# Generation-aware VMEM budget / compiler params
# ---------------------------------------------------------------------------

def _vmem_limit_bytes():
    try:
        info = pltpu.get_tpu_info()
        cap = getattr(info, "vmem_capacity_bytes", None)
        if cap:
            # ~75% of physical per-core VMEM, never above 96 MiB.
            return int(min(cap * 3 // 4, 96 * 1024 * 1024))
    except Exception:
        pass
    return 32 * 1024 * 1024


_VMEM_LIMIT = _vmem_limit_bytes()


def _cparams(num_grid_axes):
    return pltpu.CompilerParams(
        dimension_semantics=("parallel",) * num_grid_axes,
        vmem_limit_bytes=_VMEM_LIMIT)


def _pick_tile(n, candidates):
    """Largest candidate that cleanly divides n; else the whole extent."""
    for t in candidates:
        if n >= t and n % t == 0:
            return t
    return n


# ---------------------------------------------------------------------------
# Kernels
# ---------------------------------------------------------------------------

def _attn_ln_kernel(kv_ref, q_ref, m_ref, wq_ref, wk_ref, wv_ref,
                    wo_ref, bo_ref, g_ref, be_ref, o_ref, *, head_count):
    """One (batch, q-tile): multi-head attention + out proj + residual + LayerNorm.

    kv_ref : (1, Lk, E) bf16 -- source of keys AND values (same tensor in the module)
    q_ref  : (1, tq, E) bf16 -- queries; also the residual added before LayerNorm
    m_ref  : (1, tq, Lk) bf16 -- mask (0 => masked)
    wq/wk/wv : (E, E) bf16 block-diagonal projections (1/sqrt(E) folded into wq)
    wo     : (E, E) bf16; bo/g/be: (1, E) f32
    """
    kv = kv_ref[0]            # (Lk, E) bf16
    q = q_ref[0]              # (tq, E) bf16 (residual too)
    H = head_count
    E = q.shape[-1]
    D = E // H

    # Full-width block-diagonal projections: one MXU matmul each.
    qp = jnp.dot(q, wq_ref[...], preferred_element_type=jnp.float32).astype(jnp.bfloat16)
    kp = jnp.dot(kv, wk_ref[...], preferred_element_type=jnp.float32).astype(jnp.bfloat16)
    vp = jnp.dot(kv, wv_ref[...], preferred_element_type=jnp.float32).astype(jnp.bfloat16)

    # Head-major stacks (lane slices stacked along a new leading head axis).
    qh = jnp.stack([qp[:, h * D:(h + 1) * D] for h in range(H)], axis=0)   # (H, tq, D)
    kh = jnp.stack([kp[:, h * D:(h + 1) * D] for h in range(H)], axis=0)   # (H, Lk, D)
    vh = jnp.stack([vp[:, h * D:(h + 1) * D] for h in range(H)], axis=0)   # (H, Lk, D)

    # One batched MXU job over all heads (no per-head matmul loop, no scratch
    # lane-offset stores).
    energy = jnp.einsum('hqd,hkd->hqk', qh, kh,
                        preferred_element_type=jnp.float32)                # (H, tq, Lk) f32

    mask0 = (m_ref[0] == 0)                                                # (tq, Lk)
    energy = jnp.where(mask0[None, :, :], jnp.float32(-1e20), energy)
    energy = energy - jnp.max(energy, axis=-1, keepdims=True)
    p = jnp.exp(energy)
    p = p * pl.reciprocal(jnp.sum(p, axis=-1, keepdims=True), approx=True)

    ctx = jnp.einsum('hqk,hkd->hqd', p.astype(jnp.bfloat16), vh,
                     preferred_element_type=jnp.float32)                   # (H, tq, D) f32
    attn = jnp.concatenate([ctx[h] for h in range(H)], axis=1)             # (tq, E) f32

    # Output projection + bias, then fused residual add + LayerNorm (f32 stats).
    proj = jnp.dot(attn.astype(jnp.bfloat16), wo_ref[...],
                   preferred_element_type=jnp.float32) + bo_ref[...]
    x = proj + q.astype(jnp.float32)
    mu = jnp.mean(x, axis=-1, keepdims=True)
    xc = x - mu
    var = jnp.mean(xc * xc, axis=-1, keepdims=True)
    y = xc * jax.lax.rsqrt(var + 1e-5)
    o_ref[0] = (y * g_ref[...] + be_ref[...]).astype(o_ref.dtype)


def _ffn_ln_kernel(x_ref, w1_ref, b1_ref, w2_ref, b2_ref, g_ref, be_ref, o_ref):
    """Linear -> ReLU -> Linear, then fused residual add + LayerNorm."""
    x = x_ref[...]                                                          # (tm, E) bf16
    h = jnp.dot(x, w1_ref[...], preferred_element_type=jnp.float32) + b1_ref[...]
    h = jnp.maximum(h, 0.0)
    y = jnp.dot(h.astype(jnp.bfloat16), w2_ref[...],
                preferred_element_type=jnp.float32) + b2_ref[...]
    z = y + x.astype(jnp.float32)                                           # residual (f32)
    mu = jnp.mean(z, axis=-1, keepdims=True)
    zc = z - mu
    var = jnp.mean(zc * zc, axis=-1, keepdims=True)
    o_ref[...] = ((zc * jax.lax.rsqrt(var + 1e-5)) * g_ref[...]
                  + be_ref[...]).astype(o_ref.dtype)


def _linear_kernel(x_ref, w_ref, b_ref, o_ref):
    o_ref[...] = (jnp.dot(x_ref[...], w_ref[...],
                          preferred_element_type=jnp.float32)
                  + b_ref[...]).astype(o_ref.dtype)


# ---------------------------------------------------------------------------
# Wrappers
# ---------------------------------------------------------------------------

def attention_add_ln(kv, q, mask, p, gamma, beta, head_count):
    """Fused MHA(k=v=kv, q=q, mask) -> out proj -> +q residual -> LayerNorm (bf16 out)."""
    N, Lk, E = kv.shape
    Lq = q.shape[1]
    tq = _pick_tile(Lq, (512, 256, 128, 64, 32, 16, 8))
    kernel = functools.partial(_attn_ln_kernel, head_count=head_count)
    return pl.pallas_call(
        kernel,
        grid=(N, Lq // tq),
        in_specs=[
            pl.BlockSpec((1, Lk, E), lambda b, i: (b, 0, 0)),
            pl.BlockSpec((1, tq, E), lambda b, i: (b, i, 0)),
            pl.BlockSpec((1, tq, Lk), lambda b, i: (b, i, 0)),
            pl.BlockSpec((E, E), lambda b, i: (0, 0)),
            pl.BlockSpec((E, E), lambda b, i: (0, 0)),
            pl.BlockSpec((E, E), lambda b, i: (0, 0)),
            pl.BlockSpec((E, E), lambda b, i: (0, 0)),
            pl.BlockSpec((1, E), lambda b, i: (0, 0)),
            pl.BlockSpec((1, E), lambda b, i: (0, 0)),
            pl.BlockSpec((1, E), lambda b, i: (0, 0)),
        ],
        out_specs=pl.BlockSpec((1, tq, E), lambda b, i: (b, i, 0)),
        out_shape=jax.ShapeDtypeStruct((N, Lq, E), jnp.bfloat16),
        compiler_params=_cparams(2),
    )(kv, q, mask, p["wq"], p["wk"], p["wv"], p["wo"], p["bo"], gamma, beta)


def feed_forward_add_ln(x, w1, b1, w2, b2, gamma, beta):
    N, L, E = x.shape
    rows = N * L
    FF = w1.shape[1]
    # Row tile capped at 256 so the (tm, FF) f32 intermediate stays small (v7x VMEM).
    tm = _pick_tile(rows, (256, 128, 64, 32, 16, 8))
    out = pl.pallas_call(
        _ffn_ln_kernel,
        grid=(rows // tm,),
        in_specs=[
            pl.BlockSpec((tm, E), lambda i: (i, 0)),
            pl.BlockSpec((E, FF), lambda i: (0, 0)),
            pl.BlockSpec((1, FF), lambda i: (0, 0)),
            pl.BlockSpec((FF, E), lambda i: (0, 0)),
            pl.BlockSpec((1, E), lambda i: (0, 0)),
            pl.BlockSpec((1, E), lambda i: (0, 0)),
            pl.BlockSpec((1, E), lambda i: (0, 0)),
        ],
        out_specs=pl.BlockSpec((tm, E), lambda i: (i, 0)),
        out_shape=jax.ShapeDtypeStruct((rows, E), jnp.bfloat16),
        compiler_params=_cparams(1),
    )(x.reshape(rows, E), w1, b1, w2, b2, gamma, beta)
    return out.reshape(N, L, E)


def final_linear(x, w, b):
    N, L, E = x.shape
    rows = N * L
    V = w.shape[1]
    tm = _pick_tile(rows, (512, 256, 128, 64, 32, 16, 8))
    # Tile the vocab dim (lane-dense stores, weight stays within VMEM budget
    # for realistic vocabularies); fall back to full V for tiny/odd vocabs.
    tv = _pick_tile(V, (2048, 1024, 512, 256, 128)) if V % 128 == 0 else V
    out = pl.pallas_call(
        _linear_kernel,
        grid=(rows // tm, V // tv),
        in_specs=[
            pl.BlockSpec((tm, E), lambda i, j: (i, 0)),
            pl.BlockSpec((E, tv), lambda i, j: (0, j)),
            pl.BlockSpec((1, tv), lambda i, j: (0, j)),
        ],
        out_specs=pl.BlockSpec((tm, tv), lambda i, j: (i, j)),
        out_shape=jax.ShapeDtypeStruct((rows, V), jnp.float32),
        compiler_params=_cparams(2),
    )(x.reshape(rows, E), w, b)
    return out.reshape(N, L, V)


# ---------------------------------------------------------------------------
# Parameter init (deterministic, synthetic)
# ---------------------------------------------------------------------------

def init_params(key, vocab, embed, num_layers, heads, forward_expansion, max_len):
    D = embed // heads
    FF = forward_expansion * embed
    keys = iter(jax.random.split(key, 8 + num_layers * 16))

    def nrm(shape, scale=0.05, dtype=jnp.float32):
        return (jax.random.normal(next(keys), shape, jnp.float32) * scale).astype(dtype)

    eye_h = jnp.eye(heads, dtype=jnp.float32)
    # Reference scales the energy by 1/sqrt(embed_size); folded into wq (exact).
    q_scale = 1.0 / (float(embed) ** 0.5)

    def attn_params():
        # Shared (D, D) per-head weight (as in the reference), expanded once to a
        # block-diagonal (E, E) matrix so each in-kernel projection is ONE
        # full-width matmul. Matmul weights stored in bf16.
        def blockdiag(extra_scale=1.0):
            return (jnp.kron(eye_h, nrm((D, D))) * extra_scale).astype(jnp.bfloat16)
        return dict(wq=blockdiag(q_scale), wk=blockdiag(), wv=blockdiag(),
                    wo=nrm((embed, embed), dtype=jnp.bfloat16),
                    bo=nrm((1, embed)))

    layers = []
    for _ in range(num_layers):
        layers.append(dict(
            self_attn=attn_params(),
            norm_g=jnp.ones((1, embed), jnp.float32),
            norm_b=jnp.zeros((1, embed), jnp.float32),
            tblock=dict(
                attn=attn_params(),
                ln1_g=jnp.ones((1, embed), jnp.float32),
                ln1_b=jnp.zeros((1, embed), jnp.float32),
                ln2_g=jnp.ones((1, embed), jnp.float32),
                ln2_b=jnp.zeros((1, embed), jnp.float32),
                w1=nrm((embed, FF), dtype=jnp.bfloat16), b1=nrm((1, FF)),
                w2=nrm((FF, embed), dtype=jnp.bfloat16), b2=nrm((1, embed)),
            ),
        ))

    return dict(
        word_emb=nrm((vocab, embed), 1.0),
        pos_emb=nrm((max_len, embed), 1.0),
        out_w=nrm((embed, vocab), dtype=jnp.bfloat16),
        out_b=nrm((1, vocab)),
        layers=layers,
    )


# ---------------------------------------------------------------------------
# Decoder forward (mirrors Decoder.forward; dropout = identity / eval mode)
# ---------------------------------------------------------------------------

def decoder_forward(params, tokens, encoder_out, src_mask, target_mask, head_count):
    N, L = tokens.shape
    positions = jnp.arange(L)
    # Embedding gather kept as plain-JAX glue (not a Pallas hot path).
    x = (params["word_emb"][tokens]
         + params["pos_emb"][positions][None, :, :]).astype(jnp.bfloat16)
    encoder_out = encoder_out.astype(jnp.bfloat16)
    # Masks streamed at half width (values are only compared against 0).
    src_mask = src_mask.astype(jnp.bfloat16)
    target_mask = target_mask.astype(jnp.bfloat16)

    for lp in params["layers"]:
        # DecoderBlock: masked self-attention fused with Add&LayerNorm
        query = attention_add_ln(x, x, target_mask, lp["self_attn"],
                                 lp["norm_g"], lp["norm_b"], head_count)
        # TransformerBlock: cross-attention (k = v = encoder_out) fused with Add&LayerNorm
        tb = lp["tblock"]
        h = attention_add_ln(encoder_out, query, src_mask, tb["attn"],
                             tb["ln1_g"], tb["ln1_b"], head_count)
        # FeedForward fused with Add&LayerNorm
        x = feed_forward_add_ln(h, tb["w1"], tb["b1"], tb["w2"], tb["b2"],
                                tb["ln2_g"], tb["ln2_b"])

    return final_linear(x, params["out_w"], params["out_b"])


# ---------------------------------------------------------------------------

if __name__ == "__main__":
    N, L, Lsrc = 2, 8, 8
    embed_size, head_count = 32, 4
    target_vocab_size = 16
    num_layers = 2
    forward_expansion = 4
    max_length = 16

    key = jax.random.PRNGKey(0)
    k_tok, k_enc, k_par = jax.random.split(key, 3)

    tokens = jax.random.randint(k_tok, (N, L), 0, target_vocab_size)
    encoder_out = jax.random.normal(k_enc, (N, Lsrc, embed_size), jnp.float32)
    params = init_params(k_par, target_vocab_size, embed_size, num_layers,
                         head_count, forward_expansion, max_length)

    # target mask: causal lower-triangular; src mask: no padding -> all ones.
    target_mask = jnp.broadcast_to(jnp.tril(jnp.ones((L, L), jnp.float32)), (N, L, L))
    src_mask = jnp.ones((N, L, Lsrc), jnp.float32)

    out = decoder_forward(params, tokens, encoder_out, src_mask, target_mask, head_count)
    out = jax.block_until_ready(out)
    assert out.shape == (N, L, target_vocab_size)
    assert bool(jnp.all(jnp.isfinite(out)))
    print("KERNEL_OK")
</pallas_src>

<mosaic_0001>
module attributes {stable_mosaic.version = 11 : i64} {
  func.func @_attn_ln_kernel(%arg0: i32, %arg1: i32, %arg2: memref<1x8x32xbf16, #tpu.memory_space<vmem>>, %arg3: memref<1x8x32xbf16, #tpu.memory_space<vmem>>, %arg4: memref<1x8x8xbf16, #tpu.memory_space<vmem>>, %arg5: memref<32x32xbf16, #tpu.memory_space<vmem>>, %arg6: memref<32x32xbf16, #tpu.memory_space<vmem>>, %arg7: memref<32x32xbf16, #tpu.memory_space<vmem>>, %arg8: memref<32x32xbf16, #tpu.memory_space<vmem>>, %arg9: memref<1x32xf32, #tpu.memory_space<vmem>>, %arg10: memref<1x32xf32, #tpu.memory_space<vmem>>, %arg11: memref<1x32xf32, #tpu.memory_space<vmem>>, %arg12: memref<1x8x32xbf16, #tpu.memory_space<vmem>>) attributes {dimension_semantics = [#tpu.dimension_semantics<parallel>, #tpu.dimension_semantics<parallel>], iteration_bounds = array<i64: 2, 1>, scalar_prefetch = 0 : i64, scratch_operands = 0 : i64, tpu.core_type = #tpu.core_type<tc>, window_params = [{transform_indices = @transform_0, window_bounds = array<i64: 1, 8, 32>}, {transform_indices = @transform_1, window_bounds = array<i64: 1, 8, 32>}, {transform_indices = @transform_2, window_bounds = array<i64: 1, 8, 8>}, {pipeline_mode = #tpu.pipeline_mode<synchronous>, transform_indices = @transform_3, window_bounds = array<i64: 32, 32>}, {pipeline_mode = #tpu.pipeline_mode<synchronous>, transform_indices = @transform_4, window_bounds = array<i64: 32, 32>}, {pipeline_mode = #tpu.pipeline_mode<synchronous>, transform_indices = @transform_5, window_bounds = array<i64: 32, 32>}, {pipeline_mode = #tpu.pipeline_mode<synchronous>, transform_indices = @transform_6, window_bounds = array<i64: 32, 32>}, {pipeline_mode = #tpu.pipeline_mode<synchronous>, transform_indices = @transform_7, window_bounds = array<i64: 1, 32>}, {pipeline_mode = #tpu.pipeline_mode<synchronous>, transform_indices = @transform_8, window_bounds = array<i64: 1, 32>}, {pipeline_mode = #tpu.pipeline_mode<synchronous>, transform_indices = @transform_9, window_bounds = array<i64: 1, 32>}, {transform_indices = @transform_10, window_bounds = array<i64: 1, 8, 32>}]} {
    %c0 = arith.constant 0 : index
    %c0_0 = arith.constant 0 : index
    %c0_1 = arith.constant 0 : index
    %0 = vector.load %arg2[%c0, %c0_0, %c0_1] : memref<1x8x32xbf16, #tpu.memory_space<vmem>>, vector<1x8x32xbf16>
    %1 = vector.shape_cast %0 : vector<1x8x32xbf16> to vector<8x32xbf16>
    %c0_2 = arith.constant 0 : index
    %c0_3 = arith.constant 0 : index
    %c0_4 = arith.constant 0 : index
    %2 = vector.load %arg3[%c0_2, %c0_3, %c0_4] : memref<1x8x32xbf16, #tpu.memory_space<vmem>>, vector<1x8x32xbf16>
    %3 = vector.shape_cast %2 : vector<1x8x32xbf16> to vector<8x32xbf16>
    %c0_5 = arith.constant 0 : index
    %c0_6 = arith.constant 0 : index
    %4 = vector.load %arg5[%c0_5, %c0_6] : memref<32x32xbf16, #tpu.memory_space<vmem>>, vector<32x32xbf16>
    %cst = arith.constant dense<0.000000e+00> : vector<8x32xf32>
    %5 = tpu.matmul %3, %4, %cst {dimension_numbers = #tpu.dot_dimension_numbers<[1], [0], [0], [1], [0, 0, 1, 1], [], []>} : vector<8x32xbf16>, vector<32x32xbf16>, vector<8x32xf32> -> vector<8x32xf32>
    %6 = arith.truncf %5 : vector<8x32xf32> to vector<8x32xbf16>
    %c0_7 = arith.constant 0 : index
    %c0_8 = arith.constant 0 : index
    %7 = vector.load %arg6[%c0_7, %c0_8] : memref<32x32xbf16, #tpu.memory_space<vmem>>, vector<32x32xbf16>
    %cst_9 = arith.constant dense<0.000000e+00> : vector<8x32xf32>
    %8 = tpu.matmul %1, %7, %cst_9 {dimension_numbers = #tpu.dot_dimension_numbers<[1], [0], [0], [1], [0, 0, 1, 1], [], []>} : vector<8x32xbf16>, vector<32x32xbf16>, vector<8x32xf32> -> vector<8x32xf32>
    %9 = arith.truncf %8 : vector<8x32xf32> to vector<8x32xbf16>
    %c0_10 = arith.constant 0 : index
    %c0_11 = arith.constant 0 : index
    %10 = vector.load %arg7[%c0_10, %c0_11] : memref<32x32xbf16, #tpu.memory_space<vmem>>, vector<32x32xbf16>
    %cst_12 = arith.constant dense<0.000000e+00> : vector<8x32xf32>
    %11 = tpu.matmul %1, %10, %cst_12 {dimension_numbers = #tpu.dot_dimension_numbers<[1], [0], [0], [1], [0, 0, 1, 1], [], []>} : vector<8x32xbf16>, vector<32x32xbf16>, vector<8x32xf32> -> vector<8x32xf32>
    %12 = arith.truncf %11 : vector<8x32xf32> to vector<8x32xbf16>
    %13 = vector.extract_strided_slice %6 {offsets = [0, 0], sizes = [8, 8], strides = [1, 1]} : vector<8x32xbf16> to vector<8x8xbf16>
    %14 = vector.extract_strided_slice %6 {offsets = [0, 8], sizes = [8, 8], strides = [1, 1]} : vector<8x32xbf16> to vector<8x8xbf16>
    %15 = vector.extract_strided_slice %6 {offsets = [0, 16], sizes = [8, 8], strides = [1, 1]} : vector<8x32xbf16> to vector<8x8xbf16>
    %16 = vector.extract_strided_slice %6 {offsets = [0, 24], sizes = [8, 8], strides = [1, 1]} : vector<8x32xbf16> to vector<8x8xbf16>
    %17 = vector.shape_cast %13 : vector<8x8xbf16> to vector<1x8x8xbf16>
    %18 = vector.shape_cast %14 : vector<8x8xbf16> to vector<1x8x8xbf16>
    %19 = vector.shape_cast %15 : vector<8x8xbf16> to vector<1x8x8xbf16>
    %20 = vector.shape_cast %16 : vector<8x8xbf16> to vector<1x8x8xbf16>
    %21 = tpu.concatenate %17, %18, %19, %20 in 0 : vector<1x8x8xbf16>, vector<1x8x8xbf16>, vector<1x8x8xbf16>, vector<1x8x8xbf16> -> vector<4x8x8xbf16>
    %22 = vector.extract_strided_slice %9 {offsets = [0, 0], sizes = [8, 8], strides = [1, 1]} : vector<8x32xbf16> to vector<8x8xbf16>
    %23 = vector.extract_strided_slice %9 {offsets = [0, 8], sizes = [8, 8], strides = [1, 1]} : vector<8x32xbf16> to vector<8x8xbf16>
    %24 = vector.extract_strided_slice %9 {offsets = [0, 16], sizes = [8, 8], strides = [1, 1]} : vector<8x32xbf16> to vector<8x8xbf16>
    %25 = vector.extract_strided_slice %9 {offsets = [0, 24], sizes = [8, 8], strides = [1, 1]} : vector<8x32xbf16> to vector<8x8xbf16>
    %26 = vector.shape_cast %22 : vector<8x8xbf16> to vector<1x8x8xbf16>
    %27 = vector.shape_cast %23 : vector<8x8xbf16> to vector<1x8x8xbf16>
    %28 = vector.shape_cast %24 : vector<8x8xbf16> to vector<1x8x8xbf16>
    %29 = vector.shape_cast %25 : vector<8x8xbf16> to vector<1x8x8xbf16>
    %30 = tpu.concatenate %26, %27, %28, %29 in 0 : vector<1x8x8xbf16>, vector<1x8x8xbf16>, vector<1x8x8xbf16>, vector<1x8x8xbf16> -> vector<4x8x8xbf16>
    %31 = vector.extract_strided_slice %12 {offsets = [0, 0], sizes = [8, 8], strides = [1, 1]} : vector<8x32xbf16> to vector<8x8xbf16>
    %32 = vector.extract_strided_slice %12 {offsets = [0, 8], sizes = [8, 8], strides = [1, 1]} : vector<8x32xbf16> to vector<8x8xbf16>
    %33 = vector.extract_strided_slice %12 {offsets = [0, 16], sizes = [8, 8], strides = [1, 1]} : vector<8x32xbf16> to vector<8x8xbf16>
    %34 = vector.extract_strided_slice %12 {offsets = [0, 24], sizes = [8, 8], strides = [1, 1]} : vector<8x32xbf16> to vector<8x8xbf16>
    %35 = vector.shape_cast %31 : vector<8x8xbf16> to vector<1x8x8xbf16>
    %36 = vector.shape_cast %32 : vector<8x8xbf16> to vector<1x8x8xbf16>
    %37 = vector.shape_cast %33 : vector<8x8xbf16> to vector<1x8x8xbf16>
    %38 = vector.shape_cast %34 : vector<8x8xbf16> to vector<1x8x8xbf16>
    %39 = tpu.concatenate %35, %36, %37, %38 in 0 : vector<1x8x8xbf16>, vector<1x8x8xbf16>, vector<1x8x8xbf16>, vector<1x8x8xbf16> -> vector<4x8x8xbf16>
    "tpu.trace_start"() <{level = 10 : i32, message = "hqd,hkd->hqk"}> : () -> ()
    %cst_13 = arith.constant dense<0.000000e+00> : vector<4x8x8xf32>
    %40 = tpu.matmul %21, %30, %cst_13 {dimension_numbers = #tpu.dot_dimension_numbers<[2], [2], [1], [1], [0, 0, 0, 1, 1, 1], [0], [0]>} : vector<4x8x8xbf16>, vector<4x8x8xbf16>, vector<4x8x8xf32> -> vector<4x8x8xf32>
    "tpu.trace_stop"() : () -> ()
    %c0_14 = arith.constant 0 : index
    %c0_15 = arith.constant 0 : index
    %c0_16 = arith.constant 0 : index
    %41 = vector.load %arg4[%c0_14, %c0_15, %c0_16] : memref<1x8x8xbf16, #tpu.memory_space<vmem>>, vector<1x8x8xbf16>
    %42 = vector.shape_cast %41 : vector<1x8x8xbf16> to vector<8x8xbf16>
    %cst_17 = arith.constant 0.000000e+00 : bf16
    %43 = vector.broadcast %cst_17 : bf16 to vector<8x8xbf16>
    %44 = arith.cmpf oeq, %42, %43 : vector<8x8xbf16>
    %45 = vector.shape_cast %44 : vector<8x8xi1> to vector<1x8x8xi1>
    %cst_18 = arith.constant -1.000000e+20 : f32
    %46 = vector.shape_cast %45 : vector<1x8x8xi1> to vector<1x8x8xi1>
    %47 = vector.broadcast %46 : vector<1x8x8xi1> to vector<4x8x8xi1>
    %48 = vector.broadcast %cst_18 : f32 to vector<4x8x8xf32>
    %49 = arith.select %47, %48, %40 : vector<4x8x8xi1>, vector<4x8x8xf32>
    %cst_19 = arith.constant dense<0xFF800000> : vector<4x8xf32>
    %50 = vector.multi_reduction <maximumf>, %49, %cst_19 [2] : vector<4x8x8xf32> to vector<4x8xf32>
    %51 = vector.shape_cast %50 : vector<4x8xf32> to vector<4x8x1xf32>
    %52 = vector.broadcast %51 : vector<4x8x1xf32> to vector<4x8x8xf32>
    %53 = arith.subf %49, %52 : vector<4x8x8xf32>
    %54 = math.exp %53 : vector<4x8x8xf32>
    %cst_20 = arith.constant dense<0.000000e+00> : vector<4x8xf32>
    %55 = vector.multi_reduction <add>, %54, %cst_20 [2] : vector<4x8x8xf32> to vector<4x8xf32>
    %56 = vector.shape_cast %55 : vector<4x8xf32> to vector<4x8x1xf32>
    %57 = tpu.reciprocal %56 {approx = true} : vector<4x8x1xf32> -> vector<4x8x1xf32>
    %58 = vector.broadcast %57 : vector<4x8x1xf32> to vector<4x8x8xf32>
    %59 = arith.mulf %54, %58 : vector<4x8x8xf32>
    %60 = arith.truncf %59 : vector<4x8x8xf32> to vector<4x8x8xbf16>
    "tpu.trace_start"() <{level = 10 : i32, message = "hqk,hkd->hqd"}> : () -> ()
    %cst_21 = arith.constant dense<0.000000e+00> : vector<4x8x8xf32>
    %61 = tpu.matmul %60, %39, %cst_21 {dimension_numbers = #tpu.dot_dimension_numbers<[2], [1], [1], [2], [0, 0, 0, 1, 1, 2], [0], [0]>} : vector<4x8x8xbf16>, vector<4x8x8xbf16>, vector<4x8x8xf32> -> vector<4x8x8xf32>
    "tpu.trace_stop"() : () -> ()
    %62 = vector.extract_strided_slice %61 {offsets = [0, 0, 0], sizes = [1, 8, 8], strides = [1, 1, 1]} : vector<4x8x8xf32> to vector<1x8x8xf32>
    %63 = vector.shape_cast %62 : vector<1x8x8xf32> to vector<8x8xf32>
    %64 = vector.extract_strided_slice %61 {offsets = [1, 0, 0], sizes = [1, 8, 8], strides = [1, 1, 1]} : vector<4x8x8xf32> to vector<1x8x8xf32>
    %65 = vector.shape_cast %64 : vector<1x8x8xf32> to vector<8x8xf32>
    %66 = vector.extract_strided_slice %61 {offsets = [2, 0, 0], sizes = [1, 8, 8], strides = [1, 1, 1]} : vector<4x8x8xf32> to vector<1x8x8xf32>
    %67 = vector.shape_cast %66 : vector<1x8x8xf32> to vector<8x8xf32>
    %68 = vector.extract_strided_slice %61 {offsets = [3, 0, 0], sizes = [1, 8, 8], strides = [1, 1, 1]} : vector<4x8x8xf32> to vector<1x8x8xf32>
    %69 = vector.shape_cast %68 : vector<1x8x8xf32> to vector<8x8xf32>
    %70 = tpu.concatenate %63, %65, %67, %69 in 1 : vector<8x8xf32>, vector<8x8xf32>, vector<8x8xf32>, vector<8x8xf32> -> vector<8x32xf32>
    %71 = arith.truncf %70 : vector<8x32xf32> to vector<8x32xbf16>
    %c0_22 = arith.constant 0 : index
    %c0_23 = arith.constant 0 : index
    %72 = vector.load %arg8[%c0_22, %c0_23] : memref<32x32xbf16, #tpu.memory_space<vmem>>, vector<32x32xbf16>
    %cst_24 = arith.constant dense<0.000000e+00> : vector<8x32xf32>
    %73 = tpu.matmul %71, %72, %cst_24 {dimension_numbers = #tpu.dot_dimension_numbers<[1], [0], [0], [1], [0, 0, 1, 1], [], []>} : vector<8x32xbf16>, vector<32x32xbf16>, vector<8x32xf32> -> vector<8x32xf32>
    %c0_25 = arith.constant 0 : index
    %c0_26 = arith.constant 0 : index
    %74 = vector.load %arg9[%c0_25, %c0_26] : memref<1x32xf32, #tpu.memory_space<vmem>>, vector<1x32xf32>
    %75 = vector.broadcast %74 : vector<1x32xf32> to vector<8x32xf32>
    %76 = arith.addf %73, %75 : vector<8x32xf32>
    %77 = arith.extf %3 : vector<8x32xbf16> to vector<8x32xf32>
    %78 = arith.addf %76, %77 : vector<8x32xf32>
    %cst_27 = arith.constant dense<0.000000e+00> : vector<8xf32>
    %79 = vector.multi_reduction <add>, %78, %cst_27 [1] : vector<8x32xf32> to vector<8xf32>
    %80 = vector.shape_cast %79 : vector<8xf32> to vector<8x1xf32>
    %cst_28 = arith.constant 3.200000e+01 : f32
    %81 = vector.broadcast %cst_28 : f32 to vector<8x1xf32>
    %82 = arith.divf %80, %81 : vector<8x1xf32>
    %83 = vector.broadcast %82 : vector<8x1xf32> to vector<8x32xf32>
    %84 = arith.subf %78, %83 : vector<8x32xf32>
    %85 = arith.mulf %84, %84 : vector<8x32xf32>
    %cst_29 = arith.constant dense<0.000000e+00> : vector<8xf32>
    %86 = vector.multi_reduction <add>, %85, %cst_29 [1] : vector<8x32xf32> to vector<8xf32>
    %87 = vector.shape_cast %86 : vector<8xf32> to vector<8x1xf32>
    %cst_30 = arith.constant 3.200000e+01 : f32
    %88 = vector.broadcast %cst_30 : f32 to vector<8x1xf32>
    %89 = arith.divf %87, %88 : vector<8x1xf32>
    %cst_31 = arith.constant 9.99999974E-6 : f32
    %90 = vector.broadcast %cst_31 : f32 to vector<8x1xf32>
    %91 = arith.addf %89, %90 : vector<8x1xf32>
    %92 = math.rsqrt %91 : vector<8x1xf32>
    %93 = vector.broadcast %92 : vector<8x1xf32> to vector<8x32xf32>
    %94 = arith.mulf %84, %93 : vector<8x32xf32>
    %c0_32 = arith.constant 0 : index
    %c0_33 = arith.constant 0 : index
    %95 = vector.load %arg10[%c0_32, %c0_33] : memref<1x32xf32, #tpu.memory_space<vmem>>, vector<1x32xf32>
    %96 = vector.broadcast %95 : vector<1x32xf32> to vector<8x32xf32>
    %97 = arith.mulf %94, %96 : vector<8x32xf32>
    %c0_34 = arith.constant 0 : index
    %c0_35 = arith.constant 0 : index
    %98 = vector.load %arg11[%c0_34, %c0_35] : memref<1x32xf32, #tpu.memory_space<vmem>>, vector<1x32xf32>
    %99 = vector.broadcast %98 : vector<1x32xf32> to vector<8x32xf32>
    %100 = arith.addf %97, %99 : vector<8x32xf32>
    %101 = arith.truncf %100 : vector<8x32xf32> to vector<8x32xbf16>
    %c0_36 = arith.constant 0 : index
    %c0_37 = arith.constant 0 : index
    %c0_38 = arith.constant 0 : index
    %102 = vector.load %arg12[%c0_36, %c0_37, %c0_38] : memref<1x8x32xbf16, #tpu.memory_space<vmem>>, vector<1x8x32xbf16>
    %103 = vector.shape_cast %102 : vector<1x8x32xbf16> to vector<8x32xbf16>
    %104 = vector.shape_cast %101 : vector<8x32xbf16> to vector<1x8x32xbf16>
    tpu.vector_store %arg12[%c0_36, %c0_37, %c0_38], %104 {strides = array<i32>} : memref<1x8x32xbf16, #tpu.memory_space<vmem>>, vector<1x8x32xbf16>,
    return
  }
  func.func @transform_0(%arg0: i32, %arg1: i32) -> (i32, i32, i32) {
    %c0_i32 = arith.constant 0 : i32
    %c0_i32_0 = arith.constant 0 : i32
    %c0_i32_1 = arith.constant 0 : i32
    return %arg0, %c0_i32, %c0_i32_0 : i32, i32, i32
  }
  func.func @transform_1(%arg0: i32, %arg1: i32) -> (i32, i32, i32) {
    %c0_i32 = arith.constant 0 : i32
    %c0_i32_0 = arith.constant 0 : i32
    return %arg0, %arg1, %c0_i32 : i32, i32, i32
  }
  func.func @transform_2(%arg0: i32, %arg1: i32) -> (i32, i32, i32) {
    %c0_i32 = arith.constant 0 : i32
    %c0_i32_0 = arith.constant 0 : i32
    return %arg0, %arg1, %c0_i32 : i32, i32, i32
  }
  func.func @transform_3(%arg0: i32, %arg1: i32) -> (i32, i32) {
    %c0_i32 = arith.constant 0 : i32
    %c0_i32_0 = arith.constant 0 : i32
    %c0_i32_1 = arith.constant 0 : i32
    return %c0_i32, %c0_i32_0 : i32, i32
  }
  func.func @transform_4(%arg0: i32, %arg1: i32) -> (i32, i32) {
    %c0_i32 = arith.constant 0 : i32
    %c0_i32_0 = arith.constant 0 : i32
    %c0_i32_1 = arith.constant 0 : i32
    return %c0_i32, %c0_i32_0 : i32, i32
  }
  func.func @transform_5(%arg0: i32, %arg1: i32) -> (i32, i32) {
    %c0_i32 = arith.constant 0 : i32
    %c0_i32_0 = arith.constant 0 : i32
    %c0_i32_1 = arith.constant 0 : i32
    return %c0_i32, %c0_i32_0 : i32, i32
  }
  func.func @transform_6(%arg0: i32, %arg1: i32) -> (i32, i32) {
    %c0_i32 = arith.constant 0 : i32
    %c0_i32_0 = arith.constant 0 : i32
    %c0_i32_1 = arith.constant 0 : i32
    return %c0_i32, %c0_i32_0 : i32, i32
  }
  func.func @transform_7(%arg0: i32, %arg1: i32) -> (i32, i32) {
    %c0_i32 = arith.constant 0 : i32
    %c0_i32_0 = arith.constant 0 : i32
    %c0_i32_1 = arith.constant 0 : i32
    return %c0_i32, %c0_i32_0 : i32, i32
  }
  func.func @transform_8(%arg0: i32, %arg1: i32) -> (i32, i32) {
    %c0_i32 = arith.constant 0 : i32
    %c0_i32_0 = arith.constant 0 : i32
    %c0_i32_1 = arith.constant 0 : i32
    return %c0_i32, %c0_i32_0 : i32, i32
  }
  func.func @transform_9(%arg0: i32, %arg1: i32) -> (i32, i32) {
    %c0_i32 = arith.constant 0 : i32
    %c0_i32_0 = arith.constant 0 : i32
    %c0_i32_1 = arith.constant 0 : i32
    return %c0_i32, %c0_i32_0 : i32, i32
  }
  func.func @transform_10(%arg0: i32, %arg1: i32) -> (i32, i32, i32) {
    %c0_i32 = arith.constant 0 : i32
    %c0_i32_0 = arith.constant 0 : i32
    return %arg0, %arg1, %c0_i32 : i32, i32, i32
  }
}

</mosaic_0001>

<bundles_post_ra>
// kernel: tpu_custom_call.1
= control target key start
LH: loop header
LB: loop body
LE: loop exit
PB: predicated region body
PF: predicated region fallthrough
CT: control target
= control target key end

     0   :  { %s2022_s0 = inlined_call_operand.hbm [shape: bf16[2,8,32], index: 0, kind: input, shape index: {}]   ;;  %s2023_s1 = inlined_call_operand.hbm [shape: bf16[2,8,32], index: 1, kind: input, shape index: {}]   ;;  %s2024_s2 = inlined_call_operand.hbm [shape: bf16[2,8,8], index: 2, kind: input, shape index: {}]   ;;  %s2025_s3 = inlined_call_operand.hbm [shape: bf16[32,32], index: 3, kind: input, shape index: {}]   ;;  %s2026_s4 = inlined_call_operand.hbm [shape: bf16[32,32], index: 4, kind: input, shape index: {}]   ;;  %s2027_s5 = inlined_call_operand.hbm [shape: bf16[32,32], index: 5, kind: input, shape index: {}]   ;;  %s2028_s6 = inlined_call_operand.hbm [shape: bf16[32,32], index: 6, kind: input, shape index: {}]   ;;  %s2029_s7 = inlined_call_operand.vmem [shape: f32[1,32], index: 7, kind: input, shape index: {}]   ;;  %s2030_s8 = inlined_call_operand.vmem [shape: f32[1,32], index: 8, kind: input, shape index: {}]   ;;  %s2031_s9 = inlined_call_operand.vmem [shape: f32[1,32], index: 9, kind: input, shape index: {}]   ;;  %s2032_s10 = inlined_call_operand.hbm [shape: bf16[2,8,32], index: 10, kind: output, shape index: {}]  }
   0x1   :  { %2046 = sst [smem:[#allocation27_spill]] %s2022_s0 }
   0x2   :  { %2047 = sst [smem:[#allocation28_spill]] %s2023_s1 }
   0x3   :  { %2048 = sst [smem:[#allocation29_spill]] %s2025_s3 }
   0x4   :  { %2049 = sst [smem:[#allocation30_spill]] %s2026_s4 }
   0x5   :  { %2050 = sst [smem:[#allocation31_spill]] %s2027_s5 }
   0x6   :  { %2051 = sst [smem:[#allocation32_spill]] %s2028_s6 }
   0x7   :  { %15 = vsyncpa [#allocation3], 0 }
   0x8   :  { %17 = vsyncpa [#allocation3 + $0x1], 0 }
   0x9   :  { %18 = vsyncpa [#allocation6], 0 }
   0xa   :  { %20 = vsyncpa [#allocation6 + $0x1], 0 }
   0xb   :  { %21 = vsyncpa [#allocation9], 0 }
   0xc   :  { %22 = vsyncpa [#allocation12], 0 }
   0xd   :  { %23 = vsyncpa [#allocation4], 0 }
   0xe   :  { %25 = vsyncpa [#allocation4 + $0x1], 0  ;;  %s1745_s13 = smov 0   ;;  %s1747_s14 = smov 0  }
   0xf   :  { %s1749_s15 = smov 0   ;;  %s1751_s16 = smov 0  }
  0x10   :  { %s1753_s17 = smov 0   ;;  %s1755_s18 = smov 0  }
  0x11 LB: > { %2052 = sst [smem:[#allocation20_spill]] %s1655_s13  ;;  %s1776_s19 = sadd.s32 4294967295, %s1675_s18   ;;  %s1675_s18 = sphi %s1755_s18, %s31_s18   ;;  %s1671_s17 = sphi %s1753_s17, %s2081_s17   ;;  %s1667_s16 = sphi %s1751_s16, %s2080_s16   ;;  %s1663_s15 = sphi %s1749_s15, %s2084_s15   ;;  %s1659_s14 = sphi %s1747_s14, %s2083_s14   ;;  %s1655_s13 = sphi %s1745_s13, %s2082_s13  }
  0x12   : > { %2053 = sst [smem:[#allocation21_spill]] %s1671_s17  ;;  %p1149_p0 = scmp.ge.s32.totalorder %s1675_s18, 1 }
  0x13   : > { %2054 = sst [smem:[#allocation22_spill]] %s1675_s18  ;;  %p64_p1 = scmp.eq.s32.totalorder %s1776_s19, 0 }
  0x14   : > { %p305_p2 = scmp.lt.s32.totalorder %s1675_s18, 3  ;;  %s2055_s3 = sld [smem:[#allocation29_spill]] }
  0x15   : > { %s1677_s24 = smov [#allocation8]   ;;  %p1154_p6 = scmp.ge.s32.totalorder %s1675_s18, 2 }
  0x16   : > { %p1784_p3 = pnand %p1149_p0, %p305_p2  ;;  %s318_s25 = sshll.u32 %s1677_s24, 4  ;;  %s319_s25 = int_to_ptr.vmem [resolvable:$true] %s318_s25 }
  0x17   : > { %s2058_s5 = sld [smem:[#allocation31_spill]]  ;;  %s2033_s30 = smov 64  }
  0x18   : > { %p1250_p4 = pneg %p1784_p3  ;;  %s2035_s11 = smov 4  }
  0x19   : > { %s1680_s12 = smov [#allocation11]   ;;  %s1148_s21 = sadd.s32 4294967294, %s1675_s18  }
  0x1a   : > { %s316_s22 = sshll.u32 %s2055_s3, 4  ;;  %p1792_p5 = pnand %p1250_p4, %p64_p1  ;;  %s317_s22 = int_to_ptr.hbm [resolvable:$true] %s316_s22 }
  0x1b   : > { %s346_s20 = sshll.u32 %s1680_s12, 4  ;;  %s43_s24 = sadd.s32 1, %s1671_s17  ;;  %s347_s20 = int_to_ptr.vmem [resolvable:$true] %s346_s20 }
  0x1c   : > { %1253 = dma.hbm_to_vmem [thread:$0]  (!%p1792_p5), %s317_s22, 256, %s319_s25, [#allocation9], %s2033_s30, %s2033_s30, %s2035_s11  }
  0x1d   : > { %s344_s29 = sshll.u32 %s2058_s5, 4  ;;  %p45_p7 = scmp.ge.s32.totalorder %s43_s24, 2  ;;  %s345_s29 = int_to_ptr.hbm [resolvable:$true] %s344_s29 }
  0x1e   : > { %1259 = dma.hbm_to_vmem [thread:$0]  (!%p1792_p5), %s345_s29, 256, %s347_s20, [#allocation12], %s2033_s30, %s2033_s30, %s2035_s11  }
  0x1f   : > { %s50_s27 = sadd.s32 1, %s1663_s15  ;;  %p57_p8 = scmp.ne.s32.totalorder %s1663_s15, %s1659_s14 }
  0x20   : > { %p58_p9 = scmp.eq.s32.totalorder %s1675_s18, 0  ;;  %s2086_s24 = smov (%p45_p7, %s43_s24), 0 }
  0x21   : > { %2059 = sst [smem:[#allocation23_spill]] %s2086_s24  ;;  %p63_p11 = scmp.ne.s32.totalorder %s1659_s14, %s1655_s13 }
  0x22   : > { %p1818_p10 = por %p58_p9, %p57_p8  ;;  %s47_s25 = ssub.s32 %s1671_s17, %s2086_s24 }
  0x23   : > { %p292_p12 = scmp.eq.s32.totalorder %s1776_s19, 1  ;;  %p48_p13 = scmp.eq.s32.totalorder %s47_s25, 0 }
  0x24   : > { %p1829_p0 = por %p64_p1, %p63_p11  ;;  %p298_p4 = scmp.eq.s32.totalorder %s1148_s21, 1 }
  0x25   : > { %p1833_p2 = por %p292_p12, %p57_p8  ;;  %p1281_p9 = scmp.lt.s32.totalorder %s1675_s18, 2 }
  0x26   : > { %s1838_s12 = scalar_select %p48_p13, %s1663_s15, %s50_s27  }
  0x27   : > { %s2062_s29 = scalar_select %p1833_p2, 1, 0 }
  0x28   : > { %2064 = sst [smem:[#allocation25_spill]] %s1838_s12  ;;  %p1840_p7 = por %p298_p4, %p63_p11 }
  0x29   : > { %2063 = sst [smem:[#allocation24_spill]] %s2062_s29  ;;  %s2040_s30 = sand.u32 1, %s1663_s15  }
  0x2a   : > { %s2065_s20 = scalar_select %p1840_p7, 1, 0 }
  0x2b   : > { %s1847_s11 = sshll.u32 %s1671_s17, 2  ;;  %s1851_s25 = sshll.u32 %s2040_s30, 2 }
  0x2c   : > { %2066 = sst [smem:[#allocation26_spill]] %s2065_s20  ;;  %p1855_p8 = pnand %p1281_p9, %p1818_p10 }
  0x2d   : > { %s402_s21 = sand.u32 1, %s1675_s18   ;;  %s2068_s1 = sld [smem:[#allocation28_spill]] }
  0x2e   : > { %s406_s12 = scalar_lea.vmem [#allocation5], %s1851_s25  ;;  %s2069_s4 = sld [smem:[#allocation30_spill]] }
  0x2f   : > { %s415_s17 = sshll.u32 %s406_s12, 4  ;;  %s403_s29 = scalar_lea.sflag [#allocation6], %s402_s21  ;;  %s416_s17 = int_to_ptr.vmem [resolvable:$true] %s415_s17 }
  0x30   : > { %s1681_s18 = smov [#allocation10]   ;;  %s2070_s6 = sld [smem:[#allocation32_spill]] }
  0x31   : > { %s332_s5 = sshll.u32 %s1681_s18, 4  ;;  %s2071_s12 = smov 4   ;;  %s333_s5 = int_to_ptr.vmem [resolvable:$true] %s332_s5 }
  0x32   : > { %s2072_s30 = smov 64   ;;  %s1682_s21 = smov [#allocation13]  }
  0x33   : > { %s411_s24 = scalar_lea.hbm %s2068_s1, %s1847_s11  ;;  %s2073_s0 = sld [smem:[#allocation27_spill]] }
  0x34   : > { %s413_s20 = sshll.u32 %s411_s24, 4  ;;  %s330_s13 = sshll.u32 %s2069_s4, 4  ;;  %s414_s20 = int_to_ptr.hbm [resolvable:$true] %s413_s20  ;;  %s331_s13 = int_to_ptr.hbm [resolvable:$true] %s330_s13 }
  0x35   : > { %1269 = dma.hbm_to_vmem [thread:$0]  (!%p1855_p8), %s414_s20, 64, %s416_s17, %s403_s29  }
  0x36   : > { %s358_s24 = sshll.u32 %s2070_s6, 4  ;;  %s360_s17 = sshll.u32 %s1682_s21, 4  ;;  %s359_s24 = int_to_ptr.hbm [resolvable:$true] %s358_s24  ;;  %s361_s17 = int_to_ptr.vmem [resolvable:$true] %s360_s17 }
  0x37   : > { %1256 = dma.hbm_to_vmem [thread:$0]  (!%p1792_p5), %s331_s13, 256, %s333_s5, [#allocation9], %s2072_s30, %s2072_s30, %s2071_s12  }
  0x38   : > { %1262 = dma.hbm_to_vmem [thread:$0]  (!%p1792_p5), %s359_s24, 256, %s361_s17, [#allocation12], %s2072_s30, %s2072_s30, %s2071_s12  }
  0x39   : > { %s391_s18 = scalar_lea.hbm %s2073_s0, %s1847_s11  ;;  %s387_s27 = scalar_lea.vmem [#allocation2], %s1851_s25 }
  0x3a   : > { %s393_s1 = sshll.u32 %s391_s18, 4  ;;  %s395_s4 = sshll.u32 %s387_s27, 4  ;;  %s394_s1 = int_to_ptr.hbm [resolvable:$true] %s393_s1  ;;  %s396_s4 = int_to_ptr.vmem [resolvable:$true] %s395_s4 }
  0x3b   : > { %s2074_s6 = sand.u32 1, %s1663_s15   ;;  %s431_s20 = scalar_lea.hbm %s2024_s2, %s1847_s11 }
  0x3c   : > { %s384_s13 = scalar_lea.sflag [#allocation3], %s2074_s6  ;;  %s433_s22 = sshll.u32 %s431_s20, 4  ;;  %s434_s22 = int_to_ptr.hbm [resolvable:$true] %s433_s22 }
  0x3d   : > { %1266 = dma.hbm_to_vmem [thread:$0]  (!%p1855_p8), %s394_s1, 64, %s396_s4, %s384_s13  }
  0x3e   : > { %s426_s0 = scalar_lea.vmem [#allocation7], %s1851_s25  ;;  %444 = sbr.rel (%p1784_p3) target bundleno = 1395 (0x573), region = 60 }
  0x3f   : > { %s435_s26 = sshll.u32 %s426_s0, 4  ;;  %s1902_s24 = sand.u32 (!%p1784_p3), 1, %s1659_s14   ;;  %s436_s26 = int_to_ptr.vmem [resolvable:$true] %s435_s26 }
  0x40   : > { %1272 = dma.hbm_to_vmem [thread:$0]  (!%p1855_p8), %s434_s22, 64, %s436_s26, %s403_s29  }
  0x41   : > { %s1905_s4 = sshll.u32 (!%p1784_p3), %s1902_s24, 2  ;;  %s447_s6 = scalar_lea.sflag (!%p1784_p3), [#allocation3], %s1902_s24 }
  0x42   : > { %s450_s11 = scalar_lea.vmem (!%p1784_p3), [#allocation2], %s1905_s4 }
  0x43   : > { %1634 = dma.done.wait (%p1829_p0), %s447_s6, 64  }
  0x44   : > { %1636 = vsyncadd (%p1829_p0), %s447_s6, 4294967232  ;;  %s456_s0 = sand.u32 1, %s1776_s19   ;;  %s460_s23 = scalar_lea.vmem [#allocation5], %s1905_s4 }
  0x45   : > { %s457_s3 = scalar_lea.sflag [#allocation6], %s456_s0 }
  0x46   : > { %1638 = dma.done.wait (%p1829_p0), %s457_s3, 128  }
  0x47   : > { %1640 = vsyncadd (%p1829_p0), %s457_s3, 4294967168  ;;  %s470_s29 = scalar_lea.vmem [#allocation7], %s1905_s4 }
  0x48   : > { %1642 = dma.done.wait (%p64_p1), [#allocation9], 512  }
  0x49   : > { %1644 = vsyncadd (%p64_p1), [#allocation9], 4294966784 }
  0x4a   : > { %1646 = dma.done.wait (%p64_p1), [#allocation12], 512  }
  0x4b   : > { %1648 = vsyncadd (%p64_p1), [#allocation12], 4294966784  ;;  %v1221_v0 = vld [vmem:[#allocation10 + $0x8] sm:$0xff]  ;;  %v1219_v1 = vld [vmem:[#allocation8 + $0x8] sm:$0xff]  ;;  %vm557_vm0 = vcmask 261120   ;;  %vm659_vm1 = vcmask 64512  }
  0x4c   : > { %v1220_v2 = vld [vmem:[#allocation10] sm:$0xff]  ;;  %v1218_v3 = vld [vmem:[#allocation8] sm:$0xff]  ;;  %600 = vmatpush.bf16.msra.mxu1 %v1221_v0  ;;  %567 = vmatpush.bf16.msra.mxu0 %v1219_v1  ;;  %v539_v4 = vld [vmem:[%s450_s11] sm:$0xf]  ;;  %s1683_s19 = smov 120   ;;  %s1684_s28 = smov 104  }
  0x4d   : > { %v1928_v5 = vld [vmem:[%s460_s23] sm:$0xf]  ;;  %s1685_s25 = smov 112   ;;  %v1223_v13 = vld [vmem:[#allocation11 + $0x8] sm:$0xff]  ;;  %v1222_v14 = vld [vmem:[#allocation11] sm:$0xff]  ;;  %vm796_vm2 = vcmask 1043456  }
  0x4e   : > { %630 = vmatpush.bf16.msra.mxu2 %v1223_v13  ;;  %v736_v30 = vld [vmem:[%s470_s29] sm:$0xf]  ;;  %s1686_s12 = smov 16   ;;  %s1687_s30 = smov 8   ;;  %vm883_vm4 = vcmask 130048   ;;  %vm885_vm5 = vcmask 195584  }
  0x4f   : > { %v737_v31 = vunpack.c.l.bf16 %v736_v30  ;;  %s1688_s17 = smov 24   ;;  %s1215_s27 = sshll.u32 %s1667_s16, 2  ;;  %vm966_vm10 = vcmask 257024  }
  0x50   : > { %601 = vmatpush.bf16.msra.mxu1 %v1220_v2  ;;  %568 = vmatpush.bf16.msra.mxu0 %v1218_v3  ;;  %s980_s6 = scalar_lea.hbm %s2032_s10, %s1215_s27  ;;  %s537_s0 = scalar_lea.vmem [#allocation14], %s1905_s4 }
  0x51   : > { %vm738_vm3 = vcmp.eq.f32.partialorder %v737_v31, 0.0  ;;  %s982_s16 = sshll.u32 %s537_s0, 4  ;;  %s984_s3 = sshll.u32 %s980_s6, 4  ;;  %s983_s16 = int_to_ptr.vmem [resolvable:$true] %s982_s16  ;;  %s985_s3 = int_to_ptr.hbm [resolvable:$true] %s984_s3 }
  0x52   : > { %631 = vmatpush.bf16.msra.mxu2 %v1222_v14  ;;  %s969_s23 = scalar_lea.sflag [#allocation4], %s1902_s24  ;;  %s1595_s29 = sshra.s32 %s985_s3, 4  ;;  %s1596_s29 = int_to_ptr.hbm [resolvable:$true] %s1595_s29 }
  0x53   : > { %1187 = vmatmul.msk.bf16.vlgmr.msra.gmra.mxu1 %vm557_vm0, %v539_v4  ;;  %1178 = vmatmul.msk.bf16.vlgmr.msra.gmra.mxu0 %vm557_vm0, %v1928_v5  ;;  %s1601_s4 = scalar_lea.hbm %s2032_s10, 8  ;;  %p1602_p10 = scmp.lt.s32.totalorder %s1596_s29, %s2032_s10 }
  0x55   : > { %1196 = vmatmul.msk.bf16.vlgmr.msra.gmra.mxu2 %vm557_vm0, %v539_v4 }
  0xd0   : > { %v603_v6 = vpop.f32.mrf.mxu1  ;;  %v570_v7 = vpop.f32.mrf.mxu0 }
  0xd1   : > { %v607_v8 = vpack.c.bf16 %v603_v6, %v603_v6  ;;  %v574_v9 = vpack.c.bf16 %v570_v7, %v570_v7 }
  0xd3   : > { %646 = vrot.lane.b32.xlu1 %v607_v8, %s1683_s19  ;;  %650 = vrot.lane.b32.xlu0 %v607_v8, %s1684_s28  ;;  %v664_v10 = vsel %vm659_vm1, %v607_v8, 0 }
  0xd4   : > { %639 = vrot.lane.b32.xlu2 %v574_v9, %s1683_s19  ;;  %673 = vmatpush.bf16.xpose.msra.mxu3 %v664_v10 }
  0xd8   : > { %v605_v11 = vpop.f32.mrf.mxu1  ;;  %v572_v12 = vpop.f32.mrf.mxu0 }
  0xd9   : > { %v633_v26 = vpop.f32.mrf.mxu2 }
  0xda   : > { %v637_v27 = vpack.c.bf16 %v633_v26, %v633_v26 }
  0xdb   : > { %648 = vrot.lane.b32.xlu1 %v607_v8, %s1685_s25  ;;  %643 = vrot.lane.b32.xlu0 %v574_v9, %s1684_s28 }
  0xdc   : > { %1197 = vmatmul.msk.bf16.vlgmr.msra.gmra.mxu3 %vm659_vm1, %v574_v9  ;;  %641 = vrot.lane.b32.xlu2 %v574_v9, %s1685_s25  ;;  %v798_v28 = vsel %vm796_vm2, %v637_v27, 0 }
  0xdd   : > { %807 = vmatpush.bf16.msrb.mxu3 %v798_v28 }
  0xe1   : > { %v635_v29 = vpop.f32.mrf.mxu2 }
 0x12e   : > { %v640_v19 = vpop.permute.xlu2 %639 }
 0x136   : > { %v642_v23 = vpop.permute.xlu2 %641 }
 0x145   : > { %v647_v15 = vpop.permute.xlu1 %646  ;;  %v651_v16 = vpop.permute.xlu0 %650 }
 0x146   : > { %v683_v17 = vsel %vm659_vm1, %v647_v15, 0  ;;  %v721_v18 = vsel %vm659_vm1, %v651_v16, 0 }
 0x147   : > { %692 = vmatpush.bf16.xpose.msrb.mxu0 %v683_v17  ;;  %730 = vmatpush.bf16.xpose.msrb.mxu2 %v721_v18 }
 0x14d   : > { %v649_v20 = vpop.permute.xlu1 %648  ;;  %v644_v21 = vpop.permute.xlu0 %643 }
 0x14e   : > { %1198 = vmatmul.msk.bf16.vlgmr.msrb.gmra.mxu0 %vm659_vm1, %v640_v19  ;;  %1200 = vmatmul.msk.bf16.vlgmr.msrb.gmra.mxu2 %vm659_vm1, %v644_v21  ;;  %v702_v22 = vsel %vm659_vm1, %v649_v20, 0 }
 0x14f   : > { %711 = vmatpush.bf16.xpose.msrb.mxu1 %v702_v22 }
 0x156   : > { %1199 = vmatmul.msk.bf16.vlgmr.msrb.gmra.mxu1 %vm659_vm1, %v642_v23 }
 0x15f   : > { %v675_v24 = vpop.f32.mrf.mxu3 }
 0x160   : > { %v741_v43 = vsel %vm738_vm3, -1e+20, %v675_v24 }
 0x161   : > { %v745_v45 = vsel %vm659_vm1, %v741_v43, -inf }
 0x167   : > { %v677_v25 = vpop.f32.mrf.mxu3 }
 0x1cb   : > { %v694_v32 = vpop.f32.mrf.mxu0 }
 0x1cc   : > { %v742_v33 = vsel %vm738_vm3, -1e+20, %v694_v32 }
 0x1cd   : > { %v748_v34 = vsel %vm659_vm1, %v742_v33, -inf }
 0x1ce   : > { %749 = vmax.xlane.f32.xlu1 %v748_v34  ;;  %v1224_v34 = vld [vmem:[#allocation13] sm:$0xff] }
 0x1d1   : > { %v732_v35 = vpop.f32.mrf.mxu2 }
 0x1d2   : > { %v744_v36 = vsel %vm738_vm3, -1e+20, %v732_v35 }
 0x1d3   : > { %v696_v37 = vpop.f32.mrf.mxu0  ;;  %v713_v38 = vpop.f32.mrf.mxu1  ;;  %v754_v39 = vsel %vm659_vm1, %v744_v36, -inf }
 0x1d4   : > { %v743_v40 = vsel %vm738_vm3, -1e+20, %v713_v38  ;;  %755 = vmax.xlane.f32.xlu0 %v754_v39 }
 0x1d5   : > { %v751_v41 = vsel %vm659_vm1, %v743_v40, -inf }
 0x1d6   : > { %752 = vmax.xlane.f32.xlu2 %v751_v41 }
 0x1d9   : > { %v734_v42 = vpop.f32.mrf.mxu2 }
 0x1da   : > { %v1348_v42 = vld [vmem:[%s2029_s7] ss:$0 sm:$0xff] }
 0x1db   : > { %v715_v44 = vpop.f32.mrf.mxu1 }
 0x1de   : > { %746 = vmax.xlane.f32.xlu2 %v745_v45 }
 0x241   : > { %v750_v46 = vpop.xlane.xlu1 %749 }
 0x242   : > { %v758_v47 = vsub.f32 %v742_v33, %v750_v46  ;;  %v1225_v33 = vld [vmem:[#allocation13 + $0x8] sm:$0xff] }
 0x243   : > { %917 = vmatpush.bf16.msra.mxu3 %v1225_v33 }
 0x244   : > { %v763_v48 = vmul.f32 1.442695, %v758_v47 }
 0x246   : > { %1351 = vpow2.f32 %v763_v48 }
 0x247   : > { %v756_v49 = vpop.xlane.xlu0 %755  ;;  %918 = vmatpush.bf16.msra.mxu3 %v1224_v34 }
 0x248   : > { %v760_v50 = vsub.f32 %v744_v36, %v756_v49  ;;  %v1689_v49 = vmov 32.0  }
 0x249   : > { %v753_v51 = vpop.xlane.xlu2 %752 }
 0x24a   : > { %v767_v52 = vmul.f32 1.442695, %v760_v50  ;;  %v759_v53 = vsub.f32 %v743_v40, %v753_v51 }
 0x24c   : > { %v1352_v54 = vpop.eup %1351  ;;  %1353 = vpow2.f32 %v767_v52  ;;  %v765_v55 = vmul.f32 1.442695, %v759_v53 }
 0x24d   : > { %v772_v56 = vsel %vm659_vm1, %v1352_v54, 0.0 }
 0x24e   : > { %1355 = vpow2.f32 %v765_v55  ;;  %773 = vadd.xlane.f32.xlu1 %v772_v56 }
 0x251   : > { %v747_v61 = vpop.xlane.xlu2 %746 }
 0x252   : > { %v1354_v57 = vpop.eup %1353  ;;  %v757_v62 = vsub.f32 %v741_v43, %v747_v61  ;;  %v924_v43 = vunpack.c.l.bf16 %v1928_v5 }
 0x253   : > { %v778_v58 = vsel %vm659_vm1, %v1354_v57, 0.0 }
 0x254   : > { %v1356_v59 = vpop.eup %1355  ;;  %779 = vadd.xlane.f32.xlu0 %v778_v58  ;;  %v761_v63 = vmul.f32 1.442695, %v757_v62 }
 0x255   : > { %v775_v60 = vsel %vm659_vm1, %v1356_v59, 0.0 }
 0x256   : > { %776 = vadd.xlane.f32.xlu2 %v775_v60  ;;  %1357 = vpow2.f32 %v761_v63 }
 0x25c   : > { %v1358_v0 = vpop.eup %1357 }
 0x25d   : > { %v769_v1 = vsel %vm659_vm1, %v1358_v0, 0.0 }
 0x267   : > { %653 = vrot.lane.b32.xlu1 %v637_v27, %s1683_s19  ;;  %s1597_s19 = scalar_lea.hbm %s1596_s29, 4 }
 0x268   : > { %657 = vrot.lane.b32.xlu0 %v637_v27, %s1684_s28  ;;  %p1598_p1 = scmp.ne.s32.totalorder %s1596_s29, %s1597_s19  ;;  %p1603_p11 = scmp.lt.s32.totalorder %s1601_s4, %s1597_s19 }
 0x26a   : > { %p1599_p3 = pnand %p1598_p1, %p1833_p2  ;;  %p1604_p12 = por %p1603_p11, %p1602_p10 }
 0x26c   : > { %p1600_p5 = pneg %p1599_p3 }
 0x26e   : > { %655 = vrot.lane.b32.xlu2 %v637_v27, %s1685_s25  ;;  %p1605_p13 = pnand %p1604_p12, %p1600_p5 }
 0x292   : > { %770 = vadd.xlane.f32.xlu0 %v769_v1 }
 0x2c1   : > { %v774_v3 = vpop.xlane.xlu1 %773 }
 0x2c7   : > { %v780_v4 = vpop.xlane.xlu0 %779 }
 0x2c9   : > { %v777_v2 = vpop.xlane.xlu2 %776 }
 0x2ca   : > { %1359 = vrcp.f32 %v777_v2 }
 0x2cb   : > { %1361 = vrcp.f32 %v774_v3 }
 0x2cc   : > { %1363 = vrcp.f32 %v780_v4 }
 0x2d0   : > { %v1360_v6 = vpop.eup %1359 }
 0x2d1   : > { %v787_v7 = vmul.f32 %v1360_v6, %v1356_v59  ;;  %v656_v8 = vpop.permute.xlu2 %655  ;;  %v1362_v11 = vpop.eup %1361  ;;  %v1349_v6 = vld [vmem:[%s2030_s8] ss:$0 sm:$0xff] }
 0x2d2   : > { %v836_v9 = vsel %vm796_vm2, %v656_v8, 0  ;;  %v1364_v12 = vpop.eup %1363  ;;  %v786_v13 = vmul.f32 %v1362_v11, %v1352_v54  ;;  %v1350_v8 = vld [vmem:[%s2031_s9] ss:$0 sm:$0xff] }
 0x2d3   : > { %v791_v10 = vpack.c.bf16 %v787_v7, %v787_v7  ;;  %845 = vmatpush.bf16.msra.mxu1 %v836_v9  ;;  %v788_v14 = vmul.f32 %v1364_v12, %v1354_v57 }
 0x2d4   : > { %v790_v19 = vpack.c.bf16 %v786_v13, %v786_v13 }
 0x2d5   : > { %v792_v20 = vpack.c.bf16 %v788_v14, %v788_v14 }
 0x2d6   : > { %1203 = vmatmul.msk.bf16.vlgmr.msra.gmra.mxu1 %vm659_vm1, %v791_v10 }
 0x2d9   : > { %v654_v15 = vpop.permute.xlu1 %653 }
 0x2da   : > { %v817_v16 = vsel %vm796_vm2, %v654_v15, 0  ;;  %v658_v17 = vpop.permute.xlu0 %657 }
 0x2db   : > { %v855_v18 = vsel %vm796_vm2, %v658_v17, 0  ;;  %826 = vmatpush.bf16.msra.mxu0 %v817_v16 }
 0x2dc   : > { %864 = vmatpush.bf16.msra.mxu2 %v855_v18 }
 0x2de   : > { %1202 = vmatmul.msk.bf16.vlgmr.msra.gmra.mxu0 %vm659_vm1, %v790_v19 }
 0x2df   : > { %1204 = vmatmul.msk.bf16.vlgmr.msra.gmra.mxu2 %vm659_vm1, %v792_v20 }
 0x305   : > { %v771_v21 = vpop.xlane.xlu0 %770 }
 0x306   : > { %1365 = vrcp.f32 %v771_v21 }
 0x307   : > { %1367 = vrcp.f32 %v1689_v49 }
 0x30c   : > { %v1366_v22 = vpop.eup %1365 }
 0x30d   : > { %v785_v23 = vmul.f32 %v1366_v22, %v1358_v0  ;;  %v1368_v50 = vpop.eup %1367 }
 0x30e   : > { %v930_v51 = vmul.f32 32.0, %v1368_v50  ;;  %vm934_vm6 = vweird.f32 %v1368_v50 }
 0x30f   : > { %v789_v24 = vpack.c.bf16 %v785_v23, %v785_v23 }
 0x310   : > { %v931_v52 = vsub.f32 1.0, %v930_v51 }
 0x311   : > { %1201 = vmatmul.msk.bf16.vlgmr.msrb.gmra.mxu3 %vm659_vm1, %v789_v24 }
 0x312   : > { %v932_v53 = vmul.f32 %v1368_v50, %v931_v52 }
 0x314   : > { %v933_v54 = vadd.f32 %v1368_v50, %v932_v53 }
 0x316   : > { %v935_v55 = vsel %vm934_vm6, %v1368_v50, %v933_v54 }
 0x353   : > { %v847_v25 = vpop.f32.mrf.mxu1 }
 0x354   : > { %875 = vrot.lane.b32.xlu2 %v847_v25, %s1686_s12 }
 0x35b   : > { %v828_v26 = vpop.f32.mrf.mxu0  ;;  %v849_v27 = vpop.f32.mrf.mxu1 }
 0x35c   : > { %871 = vrot.lane.b32.xlu1 %v828_v26, %s1687_s30 }
 0x362   : > { %v866_v28 = vpop.f32.mrf.mxu2 }
 0x363   : > { %v830_v29 = vpop.f32.mrf.mxu0 }
 0x364   : > { %879 = vrot.lane.b32.xlu1 %v866_v28, %s1688_s17 }
 0x36a   : > { %v868_v30 = vpop.f32.mrf.mxu2 }
 0x394   : > { %v809_v31 = vpop.f32.mrf.mxu3 }
 0x39c   : > { %v811_v32 = vpop.f32.mrf.mxu3 }
 0x3ae   : > { %v876_v37 = vpop.permute.xlu2 %875 }
 0x3ce   : > { %v872_v35 = vpop.permute.xlu1 %871 }
 0x3cf   : > { %v882_v36 = vsel %vm659_vm1, %v809_v31, %v872_v35 }
 0x3d0   : > { %v884_v39 = vsel %vm883_vm4, %v882_v36, %v876_v37 }
 0x3d6   : > { %v880_v38 = vpop.permute.xlu1 %879 }
 0x3d7   : > { %v886_v40 = vsel %vm885_vm5, %v884_v39, %v880_v38 }
 0x3d8   : > { %v887_v41 = vpack.c.bf16 %v886_v40, %v886_v40 }
 0x3da   : > { %1213 = vmatmul.msk.bf16.vlgmr.msra.gmra.mxu3 %vm557_vm0, %v887_v41 }
 0x45d   : > { %v920_v44 = vpop.f32.mrf.mxu3 }
 0x45e   : > { %v921_v45 = vadd.f32 %v1348_v42, %v920_v44 }
 0x460   : > { %v925_v46 = vadd.f32 %v924_v43, %v921_v45 }
 0x462   : > { %v926_v47 = vsel %vm557_vm0, %v925_v46, 0.0 }
 0x463   : > { %927 = vadd.xlane.f32.xlu2 %v926_v47 }
 0x465   : > { %v922_v48 = vpop.f32.mrf.mxu3 }
 0x4d6   : > { %v928_v56 = vpop.xlane.xlu2 %927 }
 0x4d7   : > { %v936_v57 = vmul.f32 %v935_v55, %v928_v56 }
 0x4d9   : > { %v937_v58 = vsub.f32 %v925_v46, %v936_v57 }
 0x4db   : > { %v938_v5 = vmul.f32 %v937_v58, %v937_v58 }
 0x4dd   : > { %v939_v59 = vsel %vm557_vm0, %v938_v5, 0.0 }
 0x4de   : > { %940 = vadd.xlane.f32.xlu1 %v939_v59 }
 0x551   : > { %v941_v60 = vpop.xlane.xlu1 %940 }
 0x552   : > { %v942_v61 = vmul.f32 %v941_v60, %v935_v55 }
 0x554   : > { %v943_v62 = vadd.f32 1e-05, %v942_v61 }
 0x556   : > { %1369 = vrsqrt.f32 %v943_v62  ;;  %vm950_vm8 = vweird.f32 %v943_v62 }
 0x55c   : > { %v1370_v63 = vpop.eup %1369 }
 0x55d   : > { %v945_v0 = vmul.f32 %v1370_v63, %v943_v62  ;;  %vm951_vm7 = vweird.f32 %v1370_v63 }
 0x55e   : > { %vm952_vm9 = vmor %vm950_vm8, %vm951_vm7 }
 0x55f   : > { %v946_v1 = vmul.f32 %v1370_v63, %v945_v0 }
 0x561   : > { %v947_v2 = vmul.f32 0.5, %v946_v1 }
 0x563   : > { %v948_v3 = vsub.f32 1.5, %v947_v2 }
 0x565   : > { %v949_v4 = vmul.f32 %v1370_v63, %v948_v3 }
 0x567   : > { %v953_v7 = vsel %vm952_vm9, %v1370_v63, %v949_v4 }
 0x568   : > { %v954_v9 = vmul.f32 %v953_v7, %v937_v58 }
 0x56a   : > { %v959_v10 = vmul.f32 %v1349_v6, %v954_v9 }
 0x56c   : > { %v964_v11 = vadd.f32 %v1350_v8, %v959_v10 }
 0x56e   : > { %v965_v12 = vpack.c.bf16 %v964_v11, %v964_v11 }
 0x570   : > { %967 = vst.msk [vmem:[%s537_s0] sm:$0xf] %vm966_vm10, %v965_v12 }
 0x571   : > { %1608 = shalt.err (!%p1605_p13)
}
 0x572   : > { %1248 = dma.vmem_to_hbm [thread:$0]  (%p1833_p2), %s983_s16, 64, %s985_s3, %s969_s23  }
 0x573 PF: > { %s2076_s24 = sld [smem:[#allocation20_spill]]  ;;  %p1274_p0 = pnand %p1154_p6, %p1840_p7 }
 0x574   : > { %s2078_s18 = sld [smem:[#allocation22_spill]] }
 0x575   : > { %p1275_p4 = pneg %p1274_p0 }
 0x579   : > { %s996_s1 = sand.u32 1, %s2076_s24  }
 0x57a   : > { %s997_s27 = scalar_lea.sflag [#allocation4], %s996_s1 }
 0x57b   : > { %1650 = dma.done.wait (%p1275_p4), %s997_s27, 64  }
 0x57c   : > { %1652 = vsyncadd (%p1275_p4), %s997_s27, 4294967232  ;;  %s31_s18 = sadd.s32 1, %s2078_s18   ;;  %s2079_s5 = sld [smem:[#allocation25_spill]] }
 0x57d   : > { %p28_p9 = scmp.ge.s32.totalorder %s31_s18, 4   ;;  %s2080_s16 = sld [smem:[#allocation21_spill]] }
 0x57e   : > { %s2081_s17 = sld [smem:[#allocation23_spill]]  ;;  %s2082_s13 = smov %s1659_s14 }
 0x57f   : > { %s2083_s14 = smov %s1663_s15  ;;  %30 = sbr.rel (!%p28_p9) target bundleno = 17 (0x11), region = 145 }
 0x582   : > { %s2084_s15 = smov %s2079_s5 }
 0x584   :  { %1003 = vsyncpa [#allocation3], 1 }
 0x585   :  { %1005 = vsyncpa [#allocation3 + $0x1], 1 }
 0x586   :  { %1006 = vsyncpa [#allocation6], 1 }
 0x587   :  { %1008 = vsyncpa [#allocation6 + $0x1], 1 }
 0x588   :  { %1009 = vsyncpa [#allocation9], 1 }
 0x589   :  { %1010 = vsyncpa [#allocation12], 1 }
 0x58a   :  { %1011 = vsyncpa [#allocation4], 1 }
 0x58b   :  { %1013 = vsyncpa [#allocation4 + $0x1], 1 }

</bundles_post_ra>
